<compile_context>
chip_gen: v7x
topology: tpu7x:2x2x1
jax: 0.10.0
libtpu: 0.0.40
codegen_flags: <defaults>
</compile_context>

<pallas_src>
import jax
import jax.numpy as jnp
from jax.experimental import pallas as pl
from jax.experimental.pallas import tpu as pltpu

LANES = 128      # TPU lane width
SUBLANES = 8     # TPU sublane count
TM = 512         # output pixels (lane axis) per grid step


def conv_block_kernel(inv_sigma_ref, w_ref, p_ref, b_ref, o_ref):
    # inv_sigma_ref: (1,) scalar in SMEM (scalar prefetch)
    # w_ref: (OC_PAD8, K)   p_ref: (K, TM) im2col patches (M on lanes)
    # b_ref: (OC_PAD8, 1)   o_ref: (OC_PAD8, TM)  -- lane-dense store, no lane padding
    acc = jnp.dot(w_ref[...], p_ref[...], preferred_element_type=jnp.float32)
    o_ref[...] = (acc * inv_sigma_ref[0] + b_ref[...]).astype(o_ref.dtype)


def spectral_sigma(w_oihw, u):
    """sigma from one power iteration (torch.nn.utils.spectral_norm, training fwd)."""
    oc = w_oihw.shape[0]
    w_mat = w_oihw.reshape(oc, -1)
    eps = 1e-12
    v = w_mat.T @ u
    v = v / jnp.maximum(jnp.linalg.norm(v), eps)      # matches F.normalize (max, not +)
    u_new = w_mat @ v
    u_new = u_new / jnp.maximum(jnp.linalg.norm(u_new), eps)
    return u_new @ (w_mat @ v)
    # TODO(synk): the updated `u` power-iteration vector is not returned/carried
    # across calls (PyTorch updates it as a buffer); single-forward numerics match.


def conv_block_forward(x_nchw, w_oihw, bias, u):
    """x_nchw: (N, IC, H, W) f32.  Returns (N, OC, OH, OW)."""
    N, IC, H, W = x_nchw.shape
    OC, _, ks, _ = w_oihw.shape
    OH, OW = H - ks + 1, W - ks + 1
    K = ks * ks * IC
    M = N * OH * OW

    # ---- glue: spectral-norm scale + im2col / weight layout (plain JAX) -----
    inv_sigma = (1.0 / spectral_sigma(w_oihw, u)).reshape(1).astype(jnp.float32)

    # im2col, K-major: patches (K, M_pad), tap order (kh, kw, ic), M (= n,oh,ow) last.
    x_nhwc = jnp.transpose(x_nchw, (0, 2, 3, 1))                  # (N, H, W, IC)
    cols = [x_nhwc[:, kh:kh + OH, kw:kw + OW, :]
            for kh in range(ks) for kw in range(ks)]              # each (N, OH, OW, IC)
    patches = jnp.concatenate(cols, axis=-1)                      # (N, OH, OW, K)
    patches = jnp.transpose(patches, (3, 0, 1, 2)).reshape(K, M)  # (K, M)

    m_pad = ((M + TM - 1) // TM) * TM
    patches = jnp.pad(patches, ((0, 0), (0, m_pad - M)))          # (K, M_PAD), M lane-dense

    # Weight -> (OC_PAD8, K) in the same (kh, kw, ic) order; OC pads only to 8 sublanes.
    oc_pad = ((OC + SUBLANES - 1) // SUBLANES) * SUBLANES
    w_mat = jnp.transpose(w_oihw, (0, 2, 3, 1)).reshape(OC, K)    # (OC, K)
    w_mat = jnp.pad(w_mat, ((0, oc_pad - OC), (0, 0)))            # (OC_PAD8, K)
    b_pad = jnp.pad(bias, (0, oc_pad - OC)).reshape(oc_pad, 1)    # (OC_PAD8, 1)

    grid = (m_pad // TM,)

    cost = pl.CostEstimate(
        flops=2 * M * K * OC,
        transcendentals=0,
        bytes_accessed=4 * (K * m_pad + oc_pad * K + oc_pad + oc_pad * m_pad),
    )

    out = pl.pallas_call(
        conv_block_kernel,
        out_shape=jax.ShapeDtypeStruct((oc_pad, m_pad), x_nchw.dtype),
        grid_spec=pltpu.PrefetchScalarGridSpec(
            num_scalar_prefetch=1,                                # inv_sigma -> SMEM
            grid=grid,
            in_specs=[
                pl.BlockSpec((oc_pad, K), lambda i, s: (0, 0)),   # weight (resident)
                pl.BlockSpec((K, TM), lambda i, s: (0, i)),       # patches, M tiled on lanes
                pl.BlockSpec((oc_pad, 1), lambda i, s: (0, 0)),   # bias
            ],
            out_specs=pl.BlockSpec((oc_pad, TM), lambda i, s: (0, i)),
        ),
        compiler_params=pltpu.CompilerParams(
            dimension_semantics=("parallel",)),
        cost_estimate=cost,
    )(inv_sigma, w_mat, patches, b_pad)

    out = out[:OC, :M].reshape(OC, N, OH, OW)                     # drop padding
    return jnp.transpose(out, (1, 0, 2, 3))                       # back to NCHW


if __name__ == "__main__":
    key = jax.random.PRNGKey(0)
    k_x, k_w, k_b, k_u = jax.random.split(key, 4)

    # Shapes consistent with ConvBlock(ic=4, oc=8, ks=3)
    N, IC, OC, H, W, ks = 2, 4, 8, 16, 16, 3

    x = jax.random.normal(k_x, (N, IC, H, W), dtype=jnp.float32)
    w = jax.random.normal(k_w, (OC, IC, ks, ks), dtype=jnp.float32) * 0.1
    b = jax.random.normal(k_b, (OC,), dtype=jnp.float32) * 0.1
    u = jax.random.normal(k_u, (OC,), dtype=jnp.float32)   # spectral-norm 'u' vector

    out = conv_block_forward(x, w, b, u)
    out = jax.block_until_ready(out)

    # Sanity check against plain-JAX reference (valid conv with SN weight).
    sigma = spectral_sigma(w, u)
    ref = jax.lax.conv_general_dilated(
        x, w / sigma, window_strides=(1, 1), padding="VALID",
        dimension_numbers=("NCHW", "OIHW", "NCHW")) + b[None, :, None, None]
    assert out.shape == (N, OC, H - ks + 1, W - ks + 1)
    assert jnp.allclose(out, ref, atol=1e-4, rtol=1e-4)

    print("KERNEL_OK")
</pallas_src>

<mosaic_0001>
module attributes {stable_mosaic.version = 11 : i64} {
  func.func @conv_block_kernel(%arg0: i32, %arg1: memref<1xf32, #tpu.memory_space<smem>>, %arg2: memref<8x36xf32, #tpu.memory_space<vmem>>, %arg3: memref<36x512xf32, #tpu.memory_space<vmem>>, %arg4: memref<8x1xf32, #tpu.memory_space<vmem>>, %arg5: memref<8x512xf32, #tpu.memory_space<vmem>>) attributes {dimension_semantics = [#tpu.dimension_semantics<parallel>], iteration_bounds = array<i64: 1>, scalar_prefetch = 1 : i64, scratch_operands = 0 : i64, tpu.core_type = #tpu.core_type<tc>, window_params = [{pipeline_mode = #tpu.pipeline_mode<synchronous>, transform_indices = @transform_0, window_bounds = array<i64: 8, 36>}, {transform_indices = @transform_1, window_bounds = array<i64: 36, 512>}, {pipeline_mode = #tpu.pipeline_mode<synchronous>, transform_indices = @transform_2, window_bounds = array<i64: 8, 1>}, {transform_indices = @transform_3, window_bounds = array<i64: 8, 512>}]} {
    %c0 = arith.constant 0 : index
    %c0_0 = arith.constant 0 : index
    %0 = vector.load %arg2[%c0, %c0_0] : memref<8x36xf32, #tpu.memory_space<vmem>>, vector<8x36xf32>
    %c0_1 = arith.constant 0 : index
    %c0_2 = arith.constant 0 : index
    %1 = vector.load %arg3[%c0_1, %c0_2] : memref<36x512xf32, #tpu.memory_space<vmem>>, vector<36x512xf32>
    %cst = arith.constant dense<0.000000e+00> : vector<8x512xf32>
    %2 = tpu.matmul %0, %1, %cst {dimension_numbers = #tpu.dot_dimension_numbers<[1], [0], [0], [1], [0, 0, 1, 1], [], []>} : vector<8x36xf32>, vector<36x512xf32>, vector<8x512xf32> -> vector<8x512xf32>
    %c0_3 = arith.constant 0 : index
    %3 = memref.load %arg1[%c0_3] : memref<1xf32, #tpu.memory_space<smem>>
    %4 = vector.broadcast %3 : f32 to vector<8x512xf32>
    %5 = arith.mulf %2, %4 : vector<8x512xf32>
    %c0_4 = arith.constant 0 : index
    %c0_5 = arith.constant 0 : index
    %6 = vector.load %arg4[%c0_4, %c0_5] : memref<8x1xf32, #tpu.memory_space<vmem>>, vector<8x1xf32>
    %7 = vector.broadcast %6 : vector<8x1xf32> to vector<8x512xf32>
    %8 = arith.addf %5, %7 : vector<8x512xf32>
    %c0_6 = arith.constant 0 : index
    %c0_7 = arith.constant 0 : index
    %9 = vector.load %arg5[%c0_6, %c0_7] : memref<8x512xf32, #tpu.memory_space<vmem>>, vector<8x512xf32>
    tpu.vector_store %arg5[%c0_6, %c0_7], %8 {strides = array<i32>} : memref<8x512xf32, #tpu.memory_space<vmem>>, vector<8x512xf32>,
    return
  }
  func.func @transform_0(%arg0: i32, %arg1: memref<1xf32, #tpu.memory_space<smem>>) -> (i32, i32) {
    %c0_i32 = arith.constant 0 : i32
    %c0_i32_0 = arith.constant 0 : i32
    %c0_i32_1 = arith.constant 0 : i32
    return %c0_i32, %c0_i32_0 : i32, i32
  }
  func.func @transform_1(%arg0: i32, %arg1: memref<1xf32, #tpu.memory_space<smem>>) -> (i32, i32) {
    %c0_i32 = arith.constant 0 : i32
    %c0_i32_0 = arith.constant 0 : i32
    return %c0_i32, %arg0 : i32, i32
  }
  func.func @transform_2(%arg0: i32, %arg1: memref<1xf32, #tpu.memory_space<smem>>) -> (i32, i32) {
    %c0_i32 = arith.constant 0 : i32
    %c0_i32_0 = arith.constant 0 : i32
    %c0_i32_1 = arith.constant 0 : i32
    return %c0_i32, %c0_i32_0 : i32, i32
  }
  func.func @transform_3(%arg0: i32, %arg1: memref<1xf32, #tpu.memory_space<smem>>) -> (i32, i32) {
    %c0_i32 = arith.constant 0 : i32
    %c0_i32_0 = arith.constant 0 : i32
    return %c0_i32, %arg0 : i32, i32
  }
}

</mosaic_0001>

<bundles_post_ra>
// kernel: tpu_custom_call.1
= control target key start
LH: loop header
LB: loop body
LE: loop exit
PB: predicated region body
PF: predicated region fallthrough
CT: control target
= control target key end

     0   :  { %10 = vsyncpa [#allocation5], 0  ;;  %s387_s0 = inlined_call_operand.<no memory space> [shape: f32[1], index: 0, kind: input, shape index: {}]   ;;  %s388_s1 = inlined_call_operand.vmem [shape: f32[8,36], index: 1, kind: input, shape index: {}]   ;;  %s389_s2 = inlined_call_operand.hbm [shape: f32[36,512], index: 2, kind: input, shape index: {}]   ;;  %s390_s3 = inlined_call_operand.vmem [shape: f32[8,1], index: 3, kind: input, shape index: {}]   ;;  %s391_s4 = inlined_call_operand.hbm [shape: f32[8,512], index: 4, kind: output, shape index: {}]  }
   0x1   :  { %11 = vsyncpa [#allocation6], 0  ;;  %s323_s15 = smov [#allocation4]   ;;  %s275_s19 = scalar_lea.hbm %s389_s2, 2560 }
   0x2   :  { %s19_s16 = sshll.u32 %s323_s15, 4  ;;  %p276_p0 = scmp.ne.s32.totalorder %s389_s2, %s275_s19  ;;  %s20_s16 = int_to_ptr.vmem [resolvable:$true] %s19_s16 }
   0x3   :  { %p279_p1 = scmp.lt.u32.totalorder %s275_s19, %s389_s2 }
   0x5   :  { %p281_p2 = pnand %p279_p1, %p276_p0 }
   0x7   :  { %284 = shalt.err (!%p281_p2)
}
   0x8   :  { %s285_s24 = scalar_lea.vmem %s20_s16, 2560  ;;  %p290_p4 = scmp.lt.s32.totalorder %s20_s16, %s20_s16 }
   0x9   :  { %p286_p3 = scmp.ne.s32.totalorder %s20_s16, %s285_s24  ;;  %p291_p5 = scmp.lt.s32.totalorder %s285_s24, %s285_s24 }
   0xb   :  { %p292_p6 = por %p291_p5, %p290_p4 }
   0xd   :  { %p293_p7 = pnand %p292_p6, %p286_p3 }
   0xf   :  { %296 = shalt.err (!%p293_p7)
}
  0x10   :  { %s324_s25 = smov 512   ;;  %s325_s26 = smov 32  }
  0x11   :  { %25 = dma.hbm_to_vmem [thread:$0]  %s389_s2, 2560, %s20_s16, [#allocation5], %s324_s25, %s324_s25, %s325_s26  }
  0x12   :  { %319 = dma.done.wait [#allocation5], 2560  }
  0x13   :  { %320 = vsyncadd [#allocation5], 4294964736  ;;  %v326_v0 = vmov 0.0   ;;  %v327_v1 = vmov 0   ;;  %v33_v2 = vld [vmem:[#allocation4 + $0x8] sm:$0xff]  ;;  %v35_v4 = vld [vmem:[#allocation4 + $0x18] sm:$0xff]  ;;  %v212_v32 = vstv %s387_s0 }
  0x14   :  { %133 = vmatprep.mubr.f32.mxu0 %v326_v0  ;;  %204 = vmatprep.mubr.f32.mxu1 %v326_v0  ;;  %v37_v3 = vld [vmem:[#allocation4 + $0x28] sm:$0xff]  ;;  %v39_v6 = vld [vmem:[#allocation4 + $0x38] sm:$0xff]  ;;  %v32_v7 = vld [vmem:[#allocation4] sm:$0xff]  ;;  %vm56_vm0 = vcmask 1043456   ;;  %vm52_vm1 = vcmask 293888  }
  0x15   :  { %274 = vset.pattern.permute.xlu0 %v327_v1  ;;  %v252_v5 = vpack.c.bf16 %v37_v3, %v33_v2  ;;  %v36_v8 = vld [vmem:[#allocation4 + $0x20] sm:$0xff]  ;;  %v260_v9 = vpack.c.bf16 %v39_v6, %v35_v4  ;;  %v34_v11 = vld [vmem:[#allocation4 + $0x10] sm:$0xff]  ;;  %v41_v13 = vld [vmem:[#allocation4 + $0x48] sm:$0xff] }
  0x16   :  { %v254_v10 = vpack.c.bf16 %v36_v8, %v32_v7  ;;  %v38_v12 = vld [vmem:[#allocation4 + $0x30] sm:$0xff]  ;;  %v45_v15 = vld [vmem:[#allocation4 + $0x68] sm:$0xff]  ;;  %v43_v16 = vld [vmem:[#allocation4 + $0x58] sm:$0xff] }
  0x17   :  { %253 = vmatprep.subr.bf16.mxu0 %v252_v5  ;;  %v262_v14 = vpack.c.bf16 %v38_v12, %v34_v11  ;;  %v47_v17 = vld [vmem:[#allocation4 + $0x78] sm:$0xff]  ;;  %261 = vmatprep.subr.bf16.mxu1 %v260_v9  ;;  %v256_v18 = vpack.c.bf16 %v45_v15, %v41_v13  ;;  %v40_v20 = vld [vmem:[#allocation4 + $0x40] sm:$0xff]  ;;  %v42_v22 = vld [vmem:[#allocation4 + $0x50] sm:$0xff] }
  0x18   :  { %255 = vmatpush1.bf16.msra.mxu0 %v254_v10  ;;  %v264_v19 = vpack.c.bf16 %v47_v17, %v43_v16  ;;  %v44_v21 = vld [vmem:[#allocation4 + $0x60] sm:$0xff]  ;;  %v46_v24 = vld [vmem:[#allocation4 + $0x70] sm:$0xff]  ;;  %v49_v26 = vld [vmem:[#allocation4 + $0x88] sm:$0xf] }
  0x19   :  { %263 = vmatpush1.bf16.msra.mxu1 %v262_v14  ;;  %v258_v23 = vpack.c.bf16 %v44_v21, %v40_v20  ;;  %257 = vmatprep.subr.bf16.mxu0 %v256_v18  ;;  %v266_v25 = vpack.c.bf16 %v46_v24, %v42_v22  ;;  %v51_v27 = vld [vmem:[#allocation4 + $0x98] sm:$0xf]  ;;  %v217_v28 = vld [vmem:[%s390_s3] sm:$0xff]  ;;  %v50_v30 = vld [vmem:[#allocation4 + $0x90] sm:$0xf]  ;;  %s328_s3 = smov [#allocation7]  }
  0x1a   :  { %265 = vmatprep.subr.bf16.mxu1 %v264_v19  ;;  %220 = vperm.xlu0 %274, %v217_v28   ;;  %v48_v29 = vld [vmem:[#allocation4 + $0x80] sm:$0xf]  ;;  %s237_s8 = sshll.u32 %s328_s3, 4  ;;  %s238_s8 = int_to_ptr.vmem [resolvable:$true] %s237_s8 }
  0x1b   :  { %v31_v31 = vld [vmem:[%s388_s1] sm:$0xff]  ;;  %s297_s0 = scalar_lea.vmem %s238_s8, 512  ;;  %p302_p9 = scmp.lt.s32.totalorder %s238_s8, %s238_s8 }
  0x1c   :  { %259 = vmatpush1.bf16.msra.mxu0 %v258_v23  ;;  %p298_p8 = scmp.ne.s32.totalorder %s238_s8, %s297_s0  ;;  %p303_p10 = scmp.lt.s32.totalorder %s297_s0, %s297_s0 }
  0x1d   :  { %267 = vmatpush1.bf16.msra.mxu1 %v266_v25  ;;  %246 = vmatprep.subr.msk.mxu0 %vm56_vm0, %v49_v26 }
  0x1e   :  { %249 = vmatprep.subr.msk.mxu1 %vm56_vm0, %v51_v27  ;;  %p304_p11 = por %p303_p10, %p302_p9 }
  0x20   :  { %247 = vmatpush1.msk.msra.mxu0 %vm56_vm0, %v48_v29  ;;  %p305_p12 = pnand %p304_p11, %p298_p8 }
  0x21   :  { %250 = vmatpush1.msk.msra.mxu1 %vm56_vm0, %v50_v30  ;;  %248 = vmatmul.mubr.msk.f32.vlgmr.msra.gmra.mrb[0].mxu0 %vm52_vm1, %v31_v31 }
  0x22   :  { %251 = vmatmul.mubr.msk.f32.vlgmr.msra.gmra.mrb[0].mxu1 %vm52_vm1, %v31_v31 }
  0x99   :  { %v221_v34 = vpop.permute.xlu0 %220 }
  0xf4   :  { %v135_v33 = vpop.f32.mrb[0].mxu0 }
  0xf5   :  { %v213_v35 = vmul.f32 %v212_v32, %v135_v33  ;;  %v206_v36 = vpop.f32.mrb[0].mxu1  ;;  %v137_v37 = vpop.f32.mrb[1].mxu0 }
  0xf6   :  { %v215_v38 = vmul.f32 %v212_v32, %v206_v36  ;;  %v214_v39 = vmul.f32 %v212_v32, %v137_v37  ;;  %v208_v40 = vpop.f32.mrb[1].mxu1 }
  0xf7   :  { %v216_v41 = vmul.f32 %v212_v32, %v208_v40  ;;  %v223_v42 = vadd.f32 %v221_v34, %v213_v35 }
  0xf8   :  { %v224_v43 = vadd.f32 %v221_v34, %v214_v39  ;;  %v225_v44 = vadd.f32 %v221_v34, %v215_v38 }
  0xf9   :  { %v226_v45 = vadd.f32 %v221_v34, %v216_v41  ;;  %227 = vst [vmem:[#allocation7] sm:$0xff] %v223_v42 }
  0xfa   :  { %228 = vst [vmem:[#allocation7 + $0x8] sm:$0xff] %v224_v43  ;;  %229 = vst [vmem:[#allocation7 + $0x10] sm:$0xff] %v225_v44 }
  0xfb   :  { %230 = vst [vmem:[#allocation7 + $0x18] sm:$0xff] %v226_v45 }
  0xfc   :  { %308 = shalt.err (!%p305_p12)
}
  0xfd   :  { %s309_s10 = scalar_lea.hbm %s391_s4, 512 }
  0xfe   :  { %p310_p13 = scmp.ne.s32.totalorder %s391_s4, %s309_s10  ;;  %p313_p0 = scmp.lt.u32.totalorder %s309_s10, %s391_s4 }
 0x100   :  { %p315_p1 = pnand %p313_p0, %p310_p13 }
 0x102   :  { %318 = shalt.err (!%p315_p1)
}
 0x103   :  { %240 = dma.vmem_to_hbm [thread:$0]  %s238_s8, 512, %s391_s4, [#allocation6]  }
 0x104   :  { %321 = dma.done.wait [#allocation6], 512  }
 0x105   :  { %322 = vsyncadd [#allocation6], 4294966784 }
 0x106   :  { %244 = vsyncpa [#allocation5], 1 }
 0x107   :  { %245 = vsyncpa [#allocation6], 1 }

</bundles_post_ra>
